<compile_context>
chip_gen: v7x
topology: tpu7x:2x2x1
jax: 0.10.0
libtpu: 0.0.40
codegen_flags: <defaults>
</compile_context>

<pallas_src>
import functools

import jax
import jax.numpy as jnp
from jax import lax
from jax.experimental import pallas as pl
from jax.experimental.pallas import tpu as pltpu


def _f2t_kernel(masks_ref, x_ref, w1_ref, s1_ref, b1_ref,
                w2_ref, s2_ref, b2_ref, w3_ref, b3_ref,
                out_ref, *, N, W, block_b):
    """One grid step == block_b batch elements, lane-concatenated.

    masks_ref : (4, block_b*N) f32 factored border masks
                row0: source row r-1 valid, row1: source row r+1 valid,
                row2: source col c-1 valid, row3: source col c+1 valid
    x_ref     : (block_b, C_in, N)   input, channel-first, flattened spatial
    w1_ref    : (C_mid, 9*C_in)      conv1 weights, tap-stacked along K
    s1/b1     : (C_mid, 1)           folded BN1 scale / bias
    w2_ref    : (C_in, 9*C_mid)      conv2 weights, tap-stacked along K
    s2/b2     : (C_in, 1)            folded BN2 scale / bias
    w3_ref    : (3, C_in), b3 (3,1)  1x1 output conv
    out_ref   : (block_b, 3, N)
    """
    rm0 = masks_ref[0:1, :]
    rm2 = masks_ref[1:2, :]
    cm0 = masks_ref[2:3, :]
    cm2 = masks_ref[3:4, :]

    def conv3x3(plane, w_stacked):
        # plane: (C, BN).  Build the 9 shifted windows with lane rotations;
        # wrapped / cross-row / cross-batch lanes are zeroed by the masks.
        p_up = jnp.roll(plane, W, axis=1) * rm0       # source row r-1
        p_dn = jnp.roll(plane, -W, axis=1) * rm2      # source row r+1
        wins = []
        for pr in (p_up, plane, p_dn):                # ky = 0, 1, 2
            wins.append(jnp.roll(pr, 1, axis=1) * cm0)    # kx = 0 (col c-1)
            wins.append(pr)                                # kx = 1 (center col)
            wins.append(jnp.roll(pr, -1, axis=1) * cm2)   # kx = 2 (col c+1)
        rhs = jnp.concatenate(wins, axis=0)           # (9*C, BN)
        # One deep matmul per conv (K = 9*C) instead of 9 shallow ones.
        return jnp.dot(w_stacked, rhs, preferred_element_type=jnp.float32)

    # Lane-concatenate the batch block: pure VMEM/vreg placement when
    # N % 128 == 0 (no HBM transpose in the wrapper).
    plane = jnp.concatenate([x_ref[b] for b in range(block_b)], axis=1)

    h = conv3x3(plane, w1_ref[...])
    h = jnp.maximum(h * s1_ref[...] + b1_ref[...], 0.0)          # BN1 + ReLU
    o = conv3x3(h, w2_ref[...])
    y = jnp.maximum(o * s2_ref[...] + b2_ref[...] + plane, 0.0)  # BN2 + res + ReLU
    t = jnp.dot(w3_ref[...], y, preferred_element_type=jnp.float32) + b3_ref[...]
    t = jnp.tanh(t)                                              # (3, BN)

    for b in range(block_b):                                     # lane-dense stores
        out_ref[b] = t[:, b * N:(b + 1) * N]


def _rep(shape):
    n = len(shape)
    return pl.BlockSpec(shape, lambda i: (0,) * n)


def _factored_masks(H, W, block_b):
    """(4, block_b*H*W) f32 factored validity masks for a SAME 3x3 conv."""
    n = jnp.arange(H * W)
    r = n // W
    c = n % W
    m = jnp.stack([
        (r >= 1).astype(jnp.float32),          # source row r-1 inside image
        (r <= H - 2).astype(jnp.float32),      # source row r+1 inside image
        (c >= 1).astype(jnp.float32),          # source col c-1 inside image
        (c <= W - 2).astype(jnp.float32),      # source col c+1 inside image
    ])
    return jnp.tile(m, (1, block_b))


def _vmem_estimate(bb, C_in, C_mid, N):
    """Rough per-step VMEM bytes: double-buffered blocks + masks + live slabs."""
    C = max(C_in, C_mid)
    bn = bb * N
    io = 2 * (bb * C_in * N + bb * 3 * N) * 4     # double-buffered in/out blocks
    msk = 4 * bn * 4
    tmp = (24 * C + 8) * bn * 4                   # stacked RHS + live planes (upper bound)
    return io + msk + tmp


def _pick_block_b(B, C_in, C_mid, N, vmem_budget=20 * 2**20):
    """Largest batch block that fits the VMEM budget; prefer an even grid
    length when there is more than one step (v7x has 2 TensorCores)."""
    divs = [d for d in range(1, B + 1)
            if B % d == 0 and _vmem_estimate(d, C_in, C_mid, N) <= vmem_budget]
    if not divs:
        return 1
    bb = max(divs)                                # fewer, fatter steps (v5e/v6e single TC)
    steps = B // bb
    if steps > 1 and steps % 2:
        even = [d for d in divs if (B // d) % 2 == 0 and 2 * d >= bb]
        if even:
            bb = max(even)
    return bb


def feature2texture(x_nchw, params, *, block_b=None):
    """Pallas forward pass. Input NCHW (B, C_in, H, W); output NCHW (B, 3, H, W)."""
    B, C_in, H, W = x_nchw.shape
    C_mid = params["s1"].shape[0]
    assert params["w1"].shape == (C_mid, 9 * C_in)
    N = H * W

    # Channel-first + flattened spatial: a pure (free) reshape of NCHW.
    x_flat = x_nchw.reshape(B, C_in, N).astype(jnp.float32)

    if block_b is None:
        block_b = _pick_block_b(B, C_in, C_mid, N)
    elif B % block_b != 0:
        raise ValueError(f"block_b={block_b} must divide batch size {B}")
    BN = block_b * N
    grid = (B // block_b,)

    masks = _factored_masks(H, W, block_b)                    # (4, BN)
    kernel = functools.partial(_f2t_kernel, N=N, W=W, block_b=block_b)

    # Only raise the scoped-VMEM limit when the estimate actually needs it
    # (keeps the default on v5e's 16 MiB / v6e's 32 MiB / v7x's 32 MiB scoped,
    # and never asks for more than fits v7x's 64 MiB physical per-TC VMEM).
    est = _vmem_estimate(block_b, C_in, C_mid, N)
    cp_kwargs = dict(dimension_semantics=("parallel",))       # batch blocks independent
    if est > 12 * 2**20:
        cp_kwargs["vmem_limit_bytes"] = int(min(est + (8 << 20), 48 * 2**20))

    out = pl.pallas_call(
        kernel,
        out_shape=jax.ShapeDtypeStruct((B, 3, N), jnp.float32),
        grid_spec=pltpu.PrefetchScalarGridSpec(
            num_scalar_prefetch=0,
            grid=grid,
            in_specs=[
                _rep((4, BN)),                                   # factored masks
                pl.BlockSpec((block_b, C_in, N), lambda i: (i, 0, 0)),
                _rep((C_mid, 9 * C_in)),                         # w1 (tap-stacked)
                _rep((C_mid, 1)), _rep((C_mid, 1)),              # s1, b1
                _rep((C_in, 9 * C_mid)),                         # w2 (tap-stacked)
                _rep((C_in, 1)), _rep((C_in, 1)),                # s2, b2
                _rep((3, C_in)), _rep((3, 1)),                   # w3, b3
            ],
            out_specs=pl.BlockSpec((block_b, 3, N), lambda i: (i, 0, 0)),
        ),
        compiler_params=pltpu.CompilerParams(**cp_kwargs),
    )(masks, x_flat,
      params["w1"], params["s1"], params["b1"],
      params["w2"], params["s2"], params["b2"],
      params["w3"], params["b3"])

    return out.reshape(B, 3, H, W)                # free reshape back to NCHW


def init_params(key, in_channels, out_channels, eps=1e-5):
    """Deterministic synthetic parameters.

    Conv weights are stored tap-stacked along K: w[o, (ky*3+kx)*C_in + c] so
    each 3x3 conv is a single (C_out, 9*C_in) @ (9*C_in, BN) matmul.  BN is
    folded into per-channel scale/bias (inference mode)."""
    C_in, C_mid = in_channels, out_channels
    ks = jax.random.split(key, 12)
    w1 = 0.2 * jax.random.normal(ks[0], (3, 3, C_in, C_mid), jnp.float32)   # HWIO
    w2 = 0.2 * jax.random.normal(ks[1], (3, 3, C_mid, C_in), jnp.float32)
    w3 = 0.2 * jax.random.normal(ks[2], (3, C_in), jnp.float32)             # (out, in)
    b3 = 0.1 * jax.random.normal(ks[3], (3,), jnp.float32)

    g1 = 1.0 + 0.1 * jax.random.normal(ks[4], (C_mid,), jnp.float32)
    be1 = 0.1 * jax.random.normal(ks[5], (C_mid,), jnp.float32)
    m1 = 0.1 * jax.random.normal(ks[6], (C_mid,), jnp.float32)
    v1 = jnp.abs(jax.random.normal(ks[7], (C_mid,), jnp.float32)) + 0.5
    g2 = 1.0 + 0.1 * jax.random.normal(ks[8], (C_in,), jnp.float32)
    be2 = 0.1 * jax.random.normal(ks[9], (C_in,), jnp.float32)
    m2 = 0.1 * jax.random.normal(ks[10], (C_in,), jnp.float32)
    v2 = jnp.abs(jax.random.normal(ks[11], (C_in,), jnp.float32)) + 0.5

    s1 = g1 / jnp.sqrt(v1 + eps)
    s2 = g2 / jnp.sqrt(v2 + eps)
    return {
        # stacked (out, 9*in): element [o, (ky*3+kx)*in + c] == HWIO[ky, kx, c, o]
        "w1": jnp.transpose(w1, (3, 0, 1, 2)).reshape(C_mid, 9 * C_in),
        "s1": s1.reshape(C_mid, 1),
        "b1": (be1 - m1 * s1).reshape(C_mid, 1),
        "w2": jnp.transpose(w2, (3, 0, 1, 2)).reshape(C_in, 9 * C_mid),
        "s2": s2.reshape(C_in, 1),
        "b2": (be2 - m2 * s2).reshape(C_in, 1),
        "w3": w3,
        "b3": b3.reshape(3, 1),
    }


def reference(x_nchw, p):
    """Pure-JAX reference (HIGHEST precision) for correctness checking."""
    x = jnp.transpose(x_nchw, (0, 2, 3, 1)).astype(jnp.float32)   # NHWC
    B, H, W, _ = x.shape
    hi = lax.Precision.HIGHEST

    def conv3x3(inp, w_stacked):                     # w_stacked: (Cout, 9*Cin)
        Cout = w_stacked.shape[0]
        Cin = inp.shape[-1]
        w = w_stacked.reshape(Cout, 3, 3, Cin)
        xp = jnp.pad(inp, ((0, 0), (1, 1), (1, 1), (0, 0)))
        out = 0.0
        for ky in range(3):
            for kx in range(3):
                out = out + jnp.einsum('bhwc,oc->bhwo',
                                       xp[:, ky:ky + H, kx:kx + W, :],
                                       w[:, ky, kx, :], precision=hi)
        return out

    h = jnp.maximum(conv3x3(x, p["w1"]) * p["s1"][:, 0] + p["b1"][:, 0], 0.0)
    o = conv3x3(h, p["w2"]) * p["s2"][:, 0] + p["b2"][:, 0]
    y = jnp.maximum(o + x, 0.0)
    t = jnp.tanh(jnp.einsum('bhwc,oc->bhwo', y, p["w3"], precision=hi)
                 + p["b3"][:, 0])
    return jnp.transpose(t, (0, 3, 1, 2))


if __name__ == "__main__":
    key = jax.random.PRNGKey(0)
    kx, kp = jax.random.split(key)

    B, C_in, C_out, H, W = 2, 4, 4, 16, 16                # Feature2Texture(4, 4)
    x = jax.random.normal(kx, (B, C_in, H, W), jnp.float32)
    params = init_params(kp, C_in, C_out)

    tex = feature2texture(x, params)
    jax.block_until_ready(tex)

    assert tex.shape == (B, 3, H, W)
    ref = reference(x, params)
    err = float(jnp.max(jnp.abs(tex - ref)))
    # Tolerance explicitly accepts MXU default-precision (bf16-input) rounding
    # in the kernel vs the Precision.HIGHEST reference.
    assert err < 2e-2, f"max abs err {err}"

    print("KERNEL_OK")
</pallas_src>

<mosaic_0001>
module attributes {stable_mosaic.version = 11 : i64} {
  func.func @_f2t_kernel(%arg0: i32, %arg1: memref<4x512xf32, #tpu.memory_space<vmem>>, %arg2: memref<2x4x256xf32, #tpu.memory_space<vmem>>, %arg3: memref<4x36xf32, #tpu.memory_space<vmem>>, %arg4: memref<4x1xf32, #tpu.memory_space<vmem>>, %arg5: memref<4x1xf32, #tpu.memory_space<vmem>>, %arg6: memref<4x36xf32, #tpu.memory_space<vmem>>, %arg7: memref<4x1xf32, #tpu.memory_space<vmem>>, %arg8: memref<4x1xf32, #tpu.memory_space<vmem>>, %arg9: memref<3x4xf32, #tpu.memory_space<vmem>>, %arg10: memref<3x1xf32, #tpu.memory_space<vmem>>, %arg11: memref<2x3x256xf32, #tpu.memory_space<vmem>>) attributes {dimension_semantics = [#tpu.dimension_semantics<parallel>], iteration_bounds = array<i64: 1>, scalar_prefetch = 0 : i64, scratch_operands = 0 : i64, tpu.core_type = #tpu.core_type<tc>, window_params = [{pipeline_mode = #tpu.pipeline_mode<synchronous>, transform_indices = @transform_0, window_bounds = array<i64: 4, 512>}, {transform_indices = @transform_1, window_bounds = array<i64: 2, 4, 256>}, {pipeline_mode = #tpu.pipeline_mode<synchronous>, transform_indices = @transform_2, window_bounds = array<i64: 4, 36>}, {pipeline_mode = #tpu.pipeline_mode<synchronous>, transform_indices = @transform_3, window_bounds = array<i64: 4, 1>}, {pipeline_mode = #tpu.pipeline_mode<synchronous>, transform_indices = @transform_4, window_bounds = array<i64: 4, 1>}, {pipeline_mode = #tpu.pipeline_mode<synchronous>, transform_indices = @transform_5, window_bounds = array<i64: 4, 36>}, {pipeline_mode = #tpu.pipeline_mode<synchronous>, transform_indices = @transform_6, window_bounds = array<i64: 4, 1>}, {pipeline_mode = #tpu.pipeline_mode<synchronous>, transform_indices = @transform_7, window_bounds = array<i64: 4, 1>}, {pipeline_mode = #tpu.pipeline_mode<synchronous>, transform_indices = @transform_8, window_bounds = array<i64: 3, 4>}, {pipeline_mode = #tpu.pipeline_mode<synchronous>, transform_indices = @transform_9, window_bounds = array<i64: 3, 1>}, {transform_indices = @transform_10, window_bounds = array<i64: 2, 3, 256>}]} {
    %c0 = arith.constant 0 : index
    %c0_0 = arith.constant 0 : index
    %0 = vector.load %arg1[%c0, %c0_0] : memref<4x512xf32, #tpu.memory_space<vmem>>, vector<1x512xf32>
    %c1 = arith.constant 1 : index
    %c0_1 = arith.constant 0 : index
    %1 = vector.load %arg1[%c1, %c0_1] : memref<4x512xf32, #tpu.memory_space<vmem>>, vector<1x512xf32>
    %c2 = arith.constant 2 : index
    %c0_2 = arith.constant 0 : index
    %2 = vector.load %arg1[%c2, %c0_2] : memref<4x512xf32, #tpu.memory_space<vmem>>, vector<1x512xf32>
    %c3 = arith.constant 3 : index
    %c0_3 = arith.constant 0 : index
    %3 = vector.load %arg1[%c3, %c0_3] : memref<4x512xf32, #tpu.memory_space<vmem>>, vector<1x512xf32>
    %c0_4 = arith.constant 0 : index
    %c0_5 = arith.constant 0 : index
    %c0_6 = arith.constant 0 : index
    %4 = vector.load %arg2[%c0_4, %c0_5, %c0_6] : memref<2x4x256xf32, #tpu.memory_space<vmem>>, vector<1x4x256xf32>
    %5 = vector.shape_cast %4 : vector<1x4x256xf32> to vector<4x256xf32>
    %c1_7 = arith.constant 1 : index
    %c0_8 = arith.constant 0 : index
    %c0_9 = arith.constant 0 : index
    %6 = vector.load %arg2[%c1_7, %c0_8, %c0_9] : memref<2x4x256xf32, #tpu.memory_space<vmem>>, vector<1x4x256xf32>
    %7 = vector.shape_cast %6 : vector<1x4x256xf32> to vector<4x256xf32>
    %8 = tpu.concatenate %5, %7 in 1 : vector<4x256xf32>, vector<4x256xf32> -> vector<4x512xf32>
    %c0_10 = arith.constant 0 : index
    %c0_11 = arith.constant 0 : index
    %9 = vector.load %arg3[%c0_10, %c0_11] : memref<4x36xf32, #tpu.memory_space<vmem>>, vector<4x36xf32>
    %10 = vector.extract_strided_slice %8 {offsets = [0, 496], sizes = [4, 16], strides = [1, 1]} : vector<4x512xf32> to vector<4x16xf32>
    %11 = vector.extract_strided_slice %8 {offsets = [0, 0], sizes = [4, 496], strides = [1, 1]} : vector<4x512xf32> to vector<4x496xf32>
    %12 = tpu.concatenate %10, %11 in 1 : vector<4x16xf32>, vector<4x496xf32> -> vector<4x512xf32>
    %13 = vector.broadcast %0 : vector<1x512xf32> to vector<4x512xf32>
    %14 = arith.mulf %12, %13 : vector<4x512xf32>
    %15 = vector.extract_strided_slice %8 {offsets = [0, 16], sizes = [4, 496], strides = [1, 1]} : vector<4x512xf32> to vector<4x496xf32>
    %16 = vector.extract_strided_slice %8 {offsets = [0, 0], sizes = [4, 16], strides = [1, 1]} : vector<4x512xf32> to vector<4x16xf32>
    %17 = tpu.concatenate %15, %16 in 1 : vector<4x496xf32>, vector<4x16xf32> -> vector<4x512xf32>
    %18 = vector.broadcast %1 : vector<1x512xf32> to vector<4x512xf32>
    %19 = arith.mulf %17, %18 : vector<4x512xf32>
    %20 = vector.extract_strided_slice %14 {offsets = [0, 511], sizes = [4, 1], strides = [1, 1]} : vector<4x512xf32> to vector<4x1xf32>
    %21 = vector.extract_strided_slice %14 {offsets = [0, 0], sizes = [4, 511], strides = [1, 1]} : vector<4x512xf32> to vector<4x511xf32>
    %22 = tpu.concatenate %20, %21 in 1 : vector<4x1xf32>, vector<4x511xf32> -> vector<4x512xf32>
    %23 = vector.broadcast %2 : vector<1x512xf32> to vector<4x512xf32>
    %24 = arith.mulf %22, %23 : vector<4x512xf32>
    %25 = vector.extract_strided_slice %14 {offsets = [0, 1], sizes = [4, 511], strides = [1, 1]} : vector<4x512xf32> to vector<4x511xf32>
    %26 = vector.extract_strided_slice %14 {offsets = [0, 0], sizes = [4, 1], strides = [1, 1]} : vector<4x512xf32> to vector<4x1xf32>
    %27 = tpu.concatenate %25, %26 in 1 : vector<4x511xf32>, vector<4x1xf32> -> vector<4x512xf32>
    %28 = vector.broadcast %3 : vector<1x512xf32> to vector<4x512xf32>
    %29 = arith.mulf %27, %28 : vector<4x512xf32>
    %30 = vector.extract_strided_slice %8 {offsets = [0, 511], sizes = [4, 1], strides = [1, 1]} : vector<4x512xf32> to vector<4x1xf32>
    %31 = vector.extract_strided_slice %8 {offsets = [0, 0], sizes = [4, 511], strides = [1, 1]} : vector<4x512xf32> to vector<4x511xf32>
    %32 = tpu.concatenate %30, %31 in 1 : vector<4x1xf32>, vector<4x511xf32> -> vector<4x512xf32>
    %33 = vector.broadcast %2 : vector<1x512xf32> to vector<4x512xf32>
    %34 = arith.mulf %32, %33 : vector<4x512xf32>
    %35 = vector.extract_strided_slice %8 {offsets = [0, 1], sizes = [4, 511], strides = [1, 1]} : vector<4x512xf32> to vector<4x511xf32>
    %36 = vector.extract_strided_slice %8 {offsets = [0, 0], sizes = [4, 1], strides = [1, 1]} : vector<4x512xf32> to vector<4x1xf32>
    %37 = tpu.concatenate %35, %36 in 1 : vector<4x511xf32>, vector<4x1xf32> -> vector<4x512xf32>
    %38 = vector.broadcast %3 : vector<1x512xf32> to vector<4x512xf32>
    %39 = arith.mulf %37, %38 : vector<4x512xf32>
    %40 = vector.extract_strided_slice %19 {offsets = [0, 511], sizes = [4, 1], strides = [1, 1]} : vector<4x512xf32> to vector<4x1xf32>
    %41 = vector.extract_strided_slice %19 {offsets = [0, 0], sizes = [4, 511], strides = [1, 1]} : vector<4x512xf32> to vector<4x511xf32>
    %42 = tpu.concatenate %40, %41 in 1 : vector<4x1xf32>, vector<4x511xf32> -> vector<4x512xf32>
    %43 = vector.broadcast %2 : vector<1x512xf32> to vector<4x512xf32>
    %44 = arith.mulf %42, %43 : vector<4x512xf32>
    %45 = vector.extract_strided_slice %19 {offsets = [0, 1], sizes = [4, 511], strides = [1, 1]} : vector<4x512xf32> to vector<4x511xf32>
    %46 = vector.extract_strided_slice %19 {offsets = [0, 0], sizes = [4, 1], strides = [1, 1]} : vector<4x512xf32> to vector<4x1xf32>
    %47 = tpu.concatenate %45, %46 in 1 : vector<4x511xf32>, vector<4x1xf32> -> vector<4x512xf32>
    %48 = vector.broadcast %3 : vector<1x512xf32> to vector<4x512xf32>
    %49 = arith.mulf %47, %48 : vector<4x512xf32>
    %50 = tpu.concatenate %24, %14, %29, %34, %8, %39, %44, %19, %49 in 0 : vector<4x512xf32>, vector<4x512xf32>, vector<4x512xf32>, vector<4x512xf32>, vector<4x512xf32>, vector<4x512xf32>, vector<4x512xf32>, vector<4x512xf32>, vector<4x512xf32> -> vector<36x512xf32>
    %cst = arith.constant dense<0.000000e+00> : vector<4x512xf32>
    %51 = tpu.matmul %9, %50, %cst {dimension_numbers = #tpu.dot_dimension_numbers<[1], [0], [0], [1], [0, 0, 1, 1], [], []>} : vector<4x36xf32>, vector<36x512xf32>, vector<4x512xf32> -> vector<4x512xf32>
    %c0_12 = arith.constant 0 : index
    %c0_13 = arith.constant 0 : index
    %52 = vector.load %arg4[%c0_12, %c0_13] : memref<4x1xf32, #tpu.memory_space<vmem>>, vector<4x1xf32>
    %53 = vector.broadcast %52 : vector<4x1xf32> to vector<4x512xf32>
    %54 = arith.mulf %51, %53 : vector<4x512xf32>
    %c0_14 = arith.constant 0 : index
    %c0_15 = arith.constant 0 : index
    %55 = vector.load %arg5[%c0_14, %c0_15] : memref<4x1xf32, #tpu.memory_space<vmem>>, vector<4x1xf32>
    %56 = vector.broadcast %55 : vector<4x1xf32> to vector<4x512xf32>
    %57 = arith.addf %54, %56 : vector<4x512xf32>
    %cst_16 = arith.constant 0.000000e+00 : f32
    %58 = vector.broadcast %cst_16 : f32 to vector<4x512xf32>
    %59 = arith.maximumf %57, %58 : vector<4x512xf32>
    %c0_17 = arith.constant 0 : index
    %c0_18 = arith.constant 0 : index
    %60 = vector.load %arg6[%c0_17, %c0_18] : memref<4x36xf32, #tpu.memory_space<vmem>>, vector<4x36xf32>
    %61 = vector.extract_strided_slice %59 {offsets = [0, 496], sizes = [4, 16], strides = [1, 1]} : vector<4x512xf32> to vector<4x16xf32>
    %62 = vector.extract_strided_slice %59 {offsets = [0, 0], sizes = [4, 496], strides = [1, 1]} : vector<4x512xf32> to vector<4x496xf32>
    %63 = tpu.concatenate %61, %62 in 1 : vector<4x16xf32>, vector<4x496xf32> -> vector<4x512xf32>
    %64 = vector.broadcast %0 : vector<1x512xf32> to vector<4x512xf32>
    %65 = arith.mulf %63, %64 : vector<4x512xf32>
    %66 = vector.extract_strided_slice %59 {offsets = [0, 16], sizes = [4, 496], strides = [1, 1]} : vector<4x512xf32> to vector<4x496xf32>
    %67 = vector.extract_strided_slice %59 {offsets = [0, 0], sizes = [4, 16], strides = [1, 1]} : vector<4x512xf32> to vector<4x16xf32>
    %68 = tpu.concatenate %66, %67 in 1 : vector<4x496xf32>, vector<4x16xf32> -> vector<4x512xf32>
    %69 = vector.broadcast %1 : vector<1x512xf32> to vector<4x512xf32>
    %70 = arith.mulf %68, %69 : vector<4x512xf32>
    %71 = vector.extract_strided_slice %65 {offsets = [0, 511], sizes = [4, 1], strides = [1, 1]} : vector<4x512xf32> to vector<4x1xf32>
    %72 = vector.extract_strided_slice %65 {offsets = [0, 0], sizes = [4, 511], strides = [1, 1]} : vector<4x512xf32> to vector<4x511xf32>
    %73 = tpu.concatenate %71, %72 in 1 : vector<4x1xf32>, vector<4x511xf32> -> vector<4x512xf32>
    %74 = vector.broadcast %2 : vector<1x512xf32> to vector<4x512xf32>
    %75 = arith.mulf %73, %74 : vector<4x512xf32>
    %76 = vector.extract_strided_slice %65 {offsets = [0, 1], sizes = [4, 511], strides = [1, 1]} : vector<4x512xf32> to vector<4x511xf32>
    %77 = vector.extract_strided_slice %65 {offsets = [0, 0], sizes = [4, 1], strides = [1, 1]} : vector<4x512xf32> to vector<4x1xf32>
    %78 = tpu.concatenate %76, %77 in 1 : vector<4x511xf32>, vector<4x1xf32> -> vector<4x512xf32>
    %79 = vector.broadcast %3 : vector<1x512xf32> to vector<4x512xf32>
    %80 = arith.mulf %78, %79 : vector<4x512xf32>
    %81 = vector.extract_strided_slice %59 {offsets = [0, 511], sizes = [4, 1], strides = [1, 1]} : vector<4x512xf32> to vector<4x1xf32>
    %82 = vector.extract_strided_slice %59 {offsets = [0, 0], sizes = [4, 511], strides = [1, 1]} : vector<4x512xf32> to vector<4x511xf32>
    %83 = tpu.concatenate %81, %82 in 1 : vector<4x1xf32>, vector<4x511xf32> -> vector<4x512xf32>
    %84 = vector.broadcast %2 : vector<1x512xf32> to vector<4x512xf32>
    %85 = arith.mulf %83, %84 : vector<4x512xf32>
    %86 = vector.extract_strided_slice %59 {offsets = [0, 1], sizes = [4, 511], strides = [1, 1]} : vector<4x512xf32> to vector<4x511xf32>
    %87 = vector.extract_strided_slice %59 {offsets = [0, 0], sizes = [4, 1], strides = [1, 1]} : vector<4x512xf32> to vector<4x1xf32>
    %88 = tpu.concatenate %86, %87 in 1 : vector<4x511xf32>, vector<4x1xf32> -> vector<4x512xf32>
    %89 = vector.broadcast %3 : vector<1x512xf32> to vector<4x512xf32>
    %90 = arith.mulf %88, %89 : vector<4x512xf32>
    %91 = vector.extract_strided_slice %70 {offsets = [0, 511], sizes = [4, 1], strides = [1, 1]} : vector<4x512xf32> to vector<4x1xf32>
    %92 = vector.extract_strided_slice %70 {offsets = [0, 0], sizes = [4, 511], strides = [1, 1]} : vector<4x512xf32> to vector<4x511xf32>
    %93 = tpu.concatenate %91, %92 in 1 : vector<4x1xf32>, vector<4x511xf32> -> vector<4x512xf32>
    %94 = vector.broadcast %2 : vector<1x512xf32> to vector<4x512xf32>
    %95 = arith.mulf %93, %94 : vector<4x512xf32>
    %96 = vector.extract_strided_slice %70 {offsets = [0, 1], sizes = [4, 511], strides = [1, 1]} : vector<4x512xf32> to vector<4x511xf32>
    %97 = vector.extract_strided_slice %70 {offsets = [0, 0], sizes = [4, 1], strides = [1, 1]} : vector<4x512xf32> to vector<4x1xf32>
    %98 = tpu.concatenate %96, %97 in 1 : vector<4x511xf32>, vector<4x1xf32> -> vector<4x512xf32>
    %99 = vector.broadcast %3 : vector<1x512xf32> to vector<4x512xf32>
    %100 = arith.mulf %98, %99 : vector<4x512xf32>
    %101 = tpu.concatenate %75, %65, %80, %85, %59, %90, %95, %70, %100 in 0 : vector<4x512xf32>, vector<4x512xf32>, vector<4x512xf32>, vector<4x512xf32>, vector<4x512xf32>, vector<4x512xf32>, vector<4x512xf32>, vector<4x512xf32>, vector<4x512xf32> -> vector<36x512xf32>
    %cst_19 = arith.constant dense<0.000000e+00> : vector<4x512xf32>
    %102 = tpu.matmul %60, %101, %cst_19 {dimension_numbers = #tpu.dot_dimension_numbers<[1], [0], [0], [1], [0, 0, 1, 1], [], []>} : vector<4x36xf32>, vector<36x512xf32>, vector<4x512xf32> -> vector<4x512xf32>
    %c0_20 = arith.constant 0 : index
    %c0_21 = arith.constant 0 : index
    %103 = vector.load %arg7[%c0_20, %c0_21] : memref<4x1xf32, #tpu.memory_space<vmem>>, vector<4x1xf32>
    %104 = vector.broadcast %103 : vector<4x1xf32> to vector<4x512xf32>
    %105 = arith.mulf %102, %104 : vector<4x512xf32>
    %c0_22 = arith.constant 0 : index
    %c0_23 = arith.constant 0 : index
    %106 = vector.load %arg8[%c0_22, %c0_23] : memref<4x1xf32, #tpu.memory_space<vmem>>, vector<4x1xf32>
    %107 = vector.broadcast %106 : vector<4x1xf32> to vector<4x512xf32>
    %108 = arith.addf %105, %107 : vector<4x512xf32>
    %109 = arith.addf %108, %8 : vector<4x512xf32>
    %cst_24 = arith.constant 0.000000e+00 : f32
    %110 = vector.broadcast %cst_24 : f32 to vector<4x512xf32>
    %111 = arith.maximumf %109, %110 : vector<4x512xf32>
    %c0_25 = arith.constant 0 : index
    %c0_26 = arith.constant 0 : index
    %112 = vector.load %arg9[%c0_25, %c0_26] : memref<3x4xf32, #tpu.memory_space<vmem>>, vector<3x4xf32>
    %cst_27 = arith.constant dense<0.000000e+00> : vector<3x512xf32>
    %113 = tpu.matmul %112, %111, %cst_27 {dimension_numbers = #tpu.dot_dimension_numbers<[1], [0], [0], [1], [0, 0, 1, 1], [], []>} : vector<3x4xf32>, vector<4x512xf32>, vector<3x512xf32> -> vector<3x512xf32>
    %c0_28 = arith.constant 0 : index
    %c0_29 = arith.constant 0 : index
    %114 = vector.load %arg10[%c0_28, %c0_29] : memref<3x1xf32, #tpu.memory_space<vmem>>, vector<3x1xf32>
    %115 = vector.broadcast %114 : vector<3x1xf32> to vector<3x512xf32>
    %116 = arith.addf %113, %115 : vector<3x512xf32>
    %117 = math.tanh %116 : vector<3x512xf32>
    %118 = vector.extract_strided_slice %117 {offsets = [0, 0], sizes = [3, 256], strides = [1, 1]} : vector<3x512xf32> to vector<3x256xf32>
    %c0_30 = arith.constant 0 : index
    %c0_31 = arith.constant 0 : index
    %c0_32 = arith.constant 0 : index
    %119 = vector.load %arg11[%c0_30, %c0_31, %c0_32] : memref<2x3x256xf32, #tpu.memory_space<vmem>>, vector<1x3x256xf32>
    %120 = vector.shape_cast %119 : vector<1x3x256xf32> to vector<3x256xf32>
    %121 = vector.shape_cast %118 : vector<3x256xf32> to vector<1x3x256xf32>
    tpu.vector_store %arg11[%c0_30, %c0_31, %c0_32], %121 {strides = array<i32>} : memref<2x3x256xf32, #tpu.memory_space<vmem>>, vector<1x3x256xf32>,
    %122 = vector.extract_strided_slice %117 {offsets = [0, 256], sizes = [3, 256], strides = [1, 1]} : vector<3x512xf32> to vector<3x256xf32>
    %c1_33 = arith.constant 1 : index
    %c0_34 = arith.constant 0 : index
    %c0_35 = arith.constant 0 : index
    %123 = vector.load %arg11[%c1_33, %c0_34, %c0_35] : memref<2x3x256xf32, #tpu.memory_space<vmem>>, vector<1x3x256xf32>
    %124 = vector.shape_cast %123 : vector<1x3x256xf32> to vector<3x256xf32>
    %125 = vector.shape_cast %122 : vector<3x256xf32> to vector<1x3x256xf32>
    tpu.vector_store %arg11[%c1_33, %c0_34, %c0_35], %125 {strides = array<i32>} : memref<2x3x256xf32, #tpu.memory_space<vmem>>, vector<1x3x256xf32>,
    return
  }
  func.func @transform_0(%arg0: i32) -> (i32, i32) {
    %c0_i32 = arith.constant 0 : i32
    %c0_i32_0 = arith.constant 0 : i32
    %c0_i32_1 = arith.constant 0 : i32
    return %c0_i32, %c0_i32_0 : i32, i32
  }
  func.func @transform_1(%arg0: i32) -> (i32, i32, i32) {
    %c0_i32 = arith.constant 0 : i32
    %c0_i32_0 = arith.constant 0 : i32
    %c0_i32_1 = arith.constant 0 : i32
    return %arg0, %c0_i32, %c0_i32_0 : i32, i32, i32
  }
  func.func @transform_2(%arg0: i32) -> (i32, i32) {
    %c0_i32 = arith.constant 0 : i32
    %c0_i32_0 = arith.constant 0 : i32
    %c0_i32_1 = arith.constant 0 : i32
    return %c0_i32, %c0_i32_0 : i32, i32
  }
  func.func @transform_3(%arg0: i32) -> (i32, i32) {
    %c0_i32 = arith.constant 0 : i32
    %c0_i32_0 = arith.constant 0 : i32
    %c0_i32_1 = arith.constant 0 : i32
    return %c0_i32, %c0_i32_0 : i32, i32
  }
  func.func @transform_4(%arg0: i32) -> (i32, i32) {
    %c0_i32 = arith.constant 0 : i32
    %c0_i32_0 = arith.constant 0 : i32
    %c0_i32_1 = arith.constant 0 : i32
    return %c0_i32, %c0_i32_0 : i32, i32
  }
  func.func @transform_5(%arg0: i32) -> (i32, i32) {
    %c0_i32 = arith.constant 0 : i32
    %c0_i32_0 = arith.constant 0 : i32
    %c0_i32_1 = arith.constant 0 : i32
    return %c0_i32, %c0_i32_0 : i32, i32
  }
  func.func @transform_6(%arg0: i32) -> (i32, i32) {
    %c0_i32 = arith.constant 0 : i32
    %c0_i32_0 = arith.constant 0 : i32
    %c0_i32_1 = arith.constant 0 : i32
    return %c0_i32, %c0_i32_0 : i32, i32
  }
  func.func @transform_7(%arg0: i32) -> (i32, i32) {
    %c0_i32 = arith.constant 0 : i32
    %c0_i32_0 = arith.constant 0 : i32
    %c0_i32_1 = arith.constant 0 : i32
    return %c0_i32, %c0_i32_0 : i32, i32
  }
  func.func @transform_8(%arg0: i32) -> (i32, i32) {
    %c0_i32 = arith.constant 0 : i32
    %c0_i32_0 = arith.constant 0 : i32
    %c0_i32_1 = arith.constant 0 : i32
    return %c0_i32, %c0_i32_0 : i32, i32
  }
  func.func @transform_9(%arg0: i32) -> (i32, i32) {
    %c0_i32 = arith.constant 0 : i32
    %c0_i32_0 = arith.constant 0 : i32
    %c0_i32_1 = arith.constant 0 : i32
    return %c0_i32, %c0_i32_0 : i32, i32
  }
  func.func @transform_10(%arg0: i32) -> (i32, i32, i32) {
    %c0_i32 = arith.constant 0 : i32
    %c0_i32_0 = arith.constant 0 : i32
    %c0_i32_1 = arith.constant 0 : i32
    return %arg0, %c0_i32, %c0_i32_0 : i32, i32, i32
  }
}

</mosaic_0001>

<bundles_post_ra>
// kernel: tpu_custom_call.1
= control target key start
LH: loop header
LB: loop body
LE: loop exit
PB: predicated region body
PF: predicated region fallthrough
CT: control target
= control target key end

     0   :  { %15 = vsyncpa [#allocation3], 0  ;;  %s1275_s13 = smov [#allocation2]   ;;  %s1845_s0 = inlined_call_operand.vmem [shape: f32[4,512], index: 0, kind: input, shape index: {}]   ;;  %s1846_s1 = inlined_call_operand.hbm [shape: f32[2,4,256], index: 1, kind: input, shape index: {}]   ;;  %s1847_s2 = inlined_call_operand.vmem [shape: f32[4,36], index: 2, kind: input, shape index: {}]   ;;  %s1848_s3 = inlined_call_operand.vmem [shape: f32[4,1], index: 3, kind: input, shape index: {}]   ;;  %s1849_s4 = inlined_call_operand.vmem [shape: f32[4,1], index: 4, kind: input, shape index: {}]   ;;  %s1850_s5 = inlined_call_operand.vmem [shape: f32[4,36], index: 5, kind: input, shape index: {}]   ;;  %s1851_s6 = inlined_call_operand.vmem [shape: f32[4,1], index: 6, kind: input, shape index: {}]   ;;  %s1852_s7 = inlined_call_operand.vmem [shape: f32[4,1], index: 7, kind: input, shape index: {}]   ;;  %s1853_s8 = inlined_call_operand.vmem [shape: f32[3,4], index: 8, kind: input, shape index: {}]   ;;  %s1854_s9 = inlined_call_operand.vmem [shape: f32[3,1], index: 9, kind: input, shape index: {}]   ;;  %s1855_s10 = inlined_call_operand.vmem [shape: f32[2,3,256], index: 10, kind: output, shape index: {}]  }
   0x1   :  { %s23_s14 = sshll.u32 %s1275_s13, 4  ;;  %s1251_s17 = scalar_lea.hbm %s1846_s1, 256  ;;  %s24_s14 = int_to_ptr.vmem [resolvable:$true] %s23_s14 }
   0x2   :  { %p1252_p0 = scmp.ne.s32.totalorder %s1846_s1, %s1251_s17  ;;  %p1255_p1 = scmp.lt.u32.totalorder %s1251_s17, %s1846_s1 }
   0x4   :  { %p1257_p2 = pnand %p1255_p1, %p1252_p0 }
   0x6   :  { %1260 = shalt.err (!%p1257_p2)
}
   0x7   :  { %s1261_s22 = scalar_lea.vmem %s24_s14, 256  ;;  %p1266_p4 = scmp.lt.s32.totalorder %s24_s14, %s24_s14 }
   0x8   :  { %p1262_p3 = scmp.ne.s32.totalorder %s24_s14, %s1261_s22  ;;  %p1267_p5 = scmp.lt.s32.totalorder %s1261_s22, %s1261_s22 }
   0xa   :  { %p1268_p6 = por %p1267_p5, %p1266_p4 }
   0xc   :  { %p1269_p7 = pnand %p1268_p6, %p1262_p3 }
   0xe   :  { %1272 = shalt.err (!%p1269_p7)
}
   0xf   :  { %s1276_s23 = smov 128   ;;  %s1277_s24 = smov 8  }
  0x10   :  { %29 = dma.hbm_to_vmem [thread:$0]  %s1846_s1, 256, %s24_s14, [#allocation3], %s1276_s23, %s1276_s23, %s1277_s24  }
  0x11   :  { %1273 = dma.done.wait [#allocation3], 256  }
  0x12   :  { %1274 = vsyncadd [#allocation3], 4294967040  ;;  %v1351_v0 = vld [vmem:[#allocation2 + $0x8] sm:$0xff]  ;;  %v1353_v1 = vld [vmem:[#allocation2] sm:$0xff]  ;;  %s1278_s27 = smov 16   ;;  %s1279_s28 = smov 112   ;;  %v85_v4 = vlaneseq }
  0x13   :  { %73 = vrot.lane.b32.xlu1 %v1351_v0, %s1278_s27  ;;  %69 = vrot.lane.b32.xlu0 %v1353_v1, %s1278_s27  ;;  %v1361_v2 = vcombine.high %v1353_v1, %v1353_v1  ;;  %v1369_v3 = vcombine.high %v1351_v0, %v1351_v0  ;;  %s1280_s1 = smov 1   ;;  %s1281_s29 = smov 127   ;;  %v49_v11 = vld [vmem:[%s1845_s0] ss:$4 sm:$0xf]  ;;  %vm75_vm0 = vcmask 130048  }
  0x14   :  { %v86_v6 = vshrl.u32 %v85_v4, 7  ;;  %v1176_v29 = vld [vmem:[%s1845_s0 + $0x1] ss:$4 sm:$0xf]  ;;  %vm117_vm1 = vcmask 916480   ;;  %v1282_v44 = vmov 0.0  }
  0x15   :  { %467 = vmatprep.mubr.f32.mxu0 %v1282_v44  ;;  %538 = vmatprep.mubr.f32.mxu1 %v1282_v44  ;;  %v1283_v45 = vmov 0   ;;  %v545_v46 = vld [vmem:[%s1848_s3] sm:$0xf]  ;;  %vm165_vm2 = vcmask 7168   ;;  %vm207_vm3 = vcmask 1039360   ;;  %vm370_vm4 = vcmask 1043456  }
  0x16   :  { %v1395_v8 = vsub.s32 0, %v86_v6  ;;  %v1397_v9 = vsub.s32 3, %v86_v6  ;;  %v1402_v12 = vsub.s32 1, %v86_v6  ;;  %v1404_v13 = vsub.s32 2, %v86_v6  ;;  %1239 = vset.pattern.permute.xlu0 %v1283_v45  ;;  %1240 = vset.pattern.permute.xlu1 %v1283_v45  ;;  %v555_v47 = vld [vmem:[%s1849_s4] sm:$0xf] }
  0x17   :  { %109 = vrot.lane.b32.xlu0 %v1353_v1, %s1279_s28  ;;  %71 = vrot.lane.b32.xlu1 %v1361_v2, %s1278_s27  ;;  %v1177_v55 = vld [vmem:[%s1845_s0 + $0x2] ss:$4 sm:$0xf]  ;;  %v1178_v61 = vld [vmem:[%s1845_s0 + $0x3] ss:$4 sm:$0xf] }
  0x18   :  { %v1407_v14 = vrot.slane %v49_v11, %v1395_v8  ;;  %v1410_v15 = vrot.slane %v49_v11, %v1397_v9  ;;  %v1415_v20 = vrot.slane %v49_v11, %v1402_v12  ;;  %v1418_v21 = vrot.slane %v49_v11, %v1404_v13 }
  0x19   :  { %v1450_v31 = vrot.slane %v1176_v29, %v1395_v8  ;;  %v1453_v32 = vrot.slane %v1176_v29, %v1397_v9  ;;  %v1468_v38 = vrot.slane %v1176_v29, %v1402_v12  ;;  %v1471_v39 = vrot.slane %v1176_v29, %v1404_v13 }
  0x1a   :  { %v1509_v57 = vrot.slane %v1177_v55, %v1395_v8  ;;  %v1516_v62 = vrot.slane %v1177_v55, %v1397_v9  ;;  %v1519_v63 = vrot.slane %v1177_v55, %v1402_v12  ;;  %vm387_vm5 = vcmask 293888  }
  0x1b   :  { %66 = vrot.lane.b32.xlu0 %v1369_v3, %s1278_s27  ;;  %111 = vrot.lane.b32.xlu1 %v1361_v2, %s1279_s28  ;;  %vm998_vm6 = vcmask 31744  }
  0x1f   :  { %115 = vrot.lane.b32.xlu1 %v1369_v3, %s1279_s28  ;;  %113 = vrot.lane.b32.xlu0 %v1351_v0, %s1279_s28 }
  0x23   :  { %245 = vrot.lane.b32.xlu1 %v1353_v1, %s1280_s1  ;;  %242 = vrot.lane.b32.xlu0 %v1369_v3, %s1280_s1 }
  0x27   :  { %249 = vrot.lane.b32.xlu1 %v1351_v0, %s1280_s1  ;;  %247 = vrot.lane.b32.xlu0 %v1361_v2, %s1280_s1 }
  0x2b   :  { %265 = vrot.lane.b32.xlu1 %v1361_v2, %s1281_s29  ;;  %263 = vrot.lane.b32.xlu0 %v1353_v1, %s1281_s29 }
  0x2f   :  { %269 = vrot.lane.b32.xlu1 %v1369_v3, %s1281_s29  ;;  %267 = vrot.lane.b32.xlu0 %v1351_v0, %s1281_s29 }
  0x85   :  { %v70_v5 = vpop.permute.xlu0 %69  ;;  %v74_v7 = vpop.permute.xlu1 %73 }
  0x89   :  { %v110_v10 = vpop.permute.xlu0 %109  ;;  %v72_v16 = vpop.permute.xlu1 %71 }
  0x8a   :  { %v76_v24 = vsel %vm75_vm0, %v70_v5, %v72_v16  ;;  %v77_v25 = vsel %vm75_vm0, %v72_v16, %v74_v7 }
  0x8b   :  { %v1433_v26 = vmul.f32 %v1415_v20, %v76_v24  ;;  %v1436_v27 = vmul.f32 %v1418_v21, %v77_v25  ;;  %v1538_v24 = vrot.slane %v1178_v61, %v1404_v13 }
  0x8d   :  { %v67_v17 = vpop.permute.xlu0 %66  ;;  %v112_v28 = vpop.permute.xlu1 %111 }
  0x8e   :  { %v78_v18 = vsel %vm75_vm0, %v74_v7, %v67_v17  ;;  %v83_v19 = vsel %vm75_vm0, %v67_v17, %v70_v5  ;;  %v118_v33 = vsel %vm117_vm1, %v110_v10, %v112_v28  ;;  %v1525_v7 = vrot.slane %v1177_v55, %v1404_v13 }
  0x8f   :  { %v1421_v22 = vmul.f32 %v1407_v14, %v83_v19  ;;  %v1424_v23 = vmul.f32 %v1410_v15, %v78_v18  ;;  %v1462_v36 = vmul.f32 %v1450_v31, %v118_v33  ;;  %v1532_v18 = vrot.slane %v1178_v61, %v1397_v9 }
  0x90   :  { %v1535_v19 = vrot.slane %v1178_v61, %v1402_v12  ;;  %v332_v33 = vrot.slane %v1436_v27, 4 }
  0x91   :  { %153 = vrot.lane.b32.xlu0 %v1424_v23, %s1280_s1  ;;  %159 = vrot.lane.b32.xlu1 %v1421_v22, %s1280_s1  ;;  %v116_v30 = vpop.permute.xlu1 %115  ;;  %v114_v35 = vpop.permute.xlu0 %113  ;;  %v330_v9 = vrot.slane %v1421_v22, 4 }
  0x92   :  { %v126_v34 = vsel %vm117_vm1, %v116_v30, %v110_v10  ;;  %v119_v40 = vsel %vm117_vm1, %v112_v28, %v114_v35  ;;  %v120_v41 = vsel %vm117_vm1, %v114_v35, %v116_v30  ;;  %v1528_v10 = vrot.slane %v1178_v61, %v1395_v8 }
  0x93   :  { %v1465_v37 = vmul.f32 %v1453_v32, %v126_v34  ;;  %v1480_v42 = vmul.f32 %v1468_v38, %v119_v40  ;;  %v1483_v43 = vmul.f32 %v1471_v39, %v120_v41  ;;  %v331_v8 = vrot.slane %v1433_v26, 4 }
  0x94   :  { %v333_v30 = vrot.slane %v1424_v23, 4 }
  0x95   :  { %161 = vrot.lane.b32.xlu0 %v1433_v26, %s1280_s1  ;;  %163 = vrot.lane.b32.xlu1 %v1436_v27, %s1280_s1  ;;  %v243_v48 = vpop.permute.xlu0 %242  ;;  %v246_v49 = vpop.permute.xlu1 %245 }
  0x96   :  { %v258_v58 = vsel %vm165_vm2, %v243_v48, %v246_v49 }
  0x97   :  { %v259_v4 = vmul.f32 %v258_v58, %v1509_v57 }
  0x99   :  { %199 = vrot.lane.b32.xlu0 %v1421_v22, %s1281_s29  ;;  %201 = vrot.lane.b32.xlu1 %v1433_v26, %s1281_s29  ;;  %v248_v50 = vpop.permute.xlu0 %247  ;;  %v250_v51 = vpop.permute.xlu1 %249  ;;  %v342_v29 = vrot.slane %v259_v4, 4 }
  0x9a   :  { %v253_v5 = vsel %vm165_vm2, %v250_v51, %v243_v48  ;;  %v251_v6 = vsel %vm165_vm2, %v246_v49, %v248_v50  ;;  %v252_v17 = vsel %vm165_vm2, %v248_v50, %v250_v51 }
  0x9b   :  { %v262_v25 = vmul.f32 %v253_v5, %v1516_v62  ;;  %v260_v28 = vmul.f32 %v251_v6, %v1519_v63  ;;  %v261_v12 = vmul.f32 %v252_v17, %v1525_v7 }
  0x9d   :  { %203 = vrot.lane.b32.xlu0 %v1436_v27, %s1281_s29  ;;  %205 = vrot.lane.b32.xlu1 %v1424_v23, %s1281_s29  ;;  %v264_v52 = vpop.permute.xlu0 %263  ;;  %v266_v53 = vpop.permute.xlu1 %265  ;;  %v343_v22 = vrot.slane %v260_v28, 4  ;;  %v344_v58 = vrot.slane %v261_v12, 4 }
  0x9e   :  { %v271_v26 = vsel %vm207_vm3, %v264_v52, %v266_v53 }
  0xa1   :  { %285 = vrot.lane.b32.xlu0 %v1465_v37, %s1280_s1  ;;  %291 = vrot.lane.b32.xlu1 %v1462_v36, %s1280_s1  ;;  %v268_v54 = vpop.permute.xlu0 %267  ;;  %v270_v56 = vpop.permute.xlu1 %269 }
  0xa2   :  { %v279_v45 = vsel %vm207_vm3, %v270_v56, %v264_v52  ;;  %v273_v48 = vsel %vm207_vm3, %v268_v54, %v270_v56  ;;  %v1561_v52 = vmul.f32 %v271_v26, %v1528_v10 }
  0xa3   :  { %v282_v6 = vmul.f32 %v273_v48, %v1538_v24 }
  0xa5   :  { %293 = vrot.lane.b32.xlu0 %v1480_v42, %s1280_s1  ;;  %295 = vrot.lane.b32.xlu1 %v1483_v43, %s1280_s1 }
  0xa9   :  { %309 = vrot.lane.b32.xlu0 %v1462_v36, %s1281_s29  ;;  %311 = vrot.lane.b32.xlu1 %v1480_v42, %s1281_s29 }
  0xad   :  { %313 = vrot.lane.b32.xlu0 %v1483_v43, %s1281_s29  ;;  %315 = vrot.lane.b32.xlu1 %v1465_v37, %s1281_s29 }
  0xb1   :  { %548 = vperm.xlu0 %1239, %v545_v46   ;;  %558 = vperm.xlu1 %1240, %v555_v47   ;;  %v345_v46 = vrot.slane %v262_v25, 4  ;;  %v272_v47 = vsel %vm207_vm3, %v266_v53, %v268_v54 }
  0xb2   :  { %v281_v54 = vmul.f32 %v272_v47, %v1535_v19 }
 0x103   :  { %v154_v59 = vpop.permute.xlu0 %153  ;;  %v160_v60 = vpop.permute.xlu1 %159 }
 0x104   :  { %v173_v34 = vsel %vm165_vm2, %v154_v59, %v160_v60 }
 0x105   :  { %v195_v49 = vmul.f32 %v1509_v57, %v173_v34 }
 0x107   :  { %v162_v11 = vpop.permute.xlu0 %161  ;;  %v164_v16 = vpop.permute.xlu1 %163  ;;  %v371_v12 = vsel %vm370_vm4, %v195_v49, %v330_v9  ;;  %v355_v9 = vrot.slane %v281_v54, 4  ;;  %v356_v49 = vrot.slane %v282_v6, 4 }
 0x108   :  { %v166_v13 = vsel %vm165_vm2, %v160_v60, %v162_v11  ;;  %v168_v35 = vsel %vm165_vm2, %v164_v16, %v154_v59  ;;  %v167_v23 = vsel %vm165_vm2, %v162_v11, %v164_v16  ;;  %v283_v59 = vmul.f32 %v279_v45, %v1532_v18 }
 0x109   :  { %v196_v50 = vmul.f32 %v1519_v63, %v166_v13  ;;  %v198_v51 = vmul.f32 %v1516_v62, %v168_v35  ;;  %v197_v60 = vmul.f32 %v1525_v7, %v167_v23  ;;  %v381_v6 = vsel %vm370_vm4, %v1351_v0, %v356_v49 }
 0x10a   :  { %v357_v48 = vrot.slane %v283_v59, 4 }
 0x10b   :  { %v200_v40 = vpop.permute.xlu0 %199  ;;  %v202_v41 = vpop.permute.xlu1 %201  ;;  %v372_v25 = vsel %vm370_vm4, %v196_v50, %v331_v8  ;;  %v374_v28 = vsel %vm370_vm4, %v198_v51, %v333_v30  ;;  %v373_v26 = vsel %vm370_vm4, %v197_v60, %v332_v33  ;;  %v363_v33 = vrot.slane %v1480_v42, 4 }
 0x10c   :  { %v208_v27 = vsel %vm207_vm3, %v200_v40, %v202_v41 }
 0x10d   :  { %v238_v55 = vmul.f32 %v1528_v10, %v208_v27 }
 0x10f   :  { %v204_v61 = vpop.permute.xlu0 %203  ;;  %v206_v53 = vpop.permute.xlu1 %205  ;;  %v375_v34 = vsel %vm370_vm4, %v238_v55, %v342_v29  ;;  %v354_v55 = vrot.slane %v1561_v52, 4  ;;  %v382_v52 = vsel %vm370_vm4, %v1369_v3, %v357_v48 }
 0x110   :  { %v209_v56 = vsel %vm207_vm3, %v202_v41, %v204_v61  ;;  %v210_v4 = vsel %vm207_vm3, %v204_v61, %v206_v53  ;;  %v216_v5 = vsel %vm207_vm3, %v206_v53, %v200_v40  ;;  %v1200_v30 = vpack.c.bf16 %v375_v34, %v371_v12 }
 0x111   :  { %v239_v11 = vmul.f32 %v1535_v19, %v209_v56  ;;  %v240_v16 = vmul.f32 %v1538_v24, %v210_v4  ;;  %v241_v17 = vmul.f32 %v1532_v18, %v216_v5  ;;  %v364_v61 = vrot.slane %v1483_v43, 4 }
 0x112   :  { %v380_v53 = vsel %vm370_vm4, %v1361_v2, %v355_v9 }
 0x113   :  { %v286_v13 = vpop.permute.xlu0 %285  ;;  %v292_v35 = vpop.permute.xlu1 %291  ;;  %v376_v40 = vsel %vm370_vm4, %v239_v11, %v343_v22  ;;  %v378_v41 = vsel %vm370_vm4, %v241_v17, %v345_v46  ;;  %v377_v45 = vsel %vm370_vm4, %v240_v16, %v344_v58  ;;  %v362_v22 = vrot.slane %v1462_v36, 4 }
 0x114   :  { %v304_v23 = vsel %vm165_vm2, %v286_v13, %v292_v35  ;;  %v1198_v27 = vpack.c.bf16 %v376_v40, %v372_v25  ;;  %v1206_v8 = vpack.c.bf16 %v378_v41, %v374_v28  ;;  %v1208_v47 = vpack.c.bf16 %v377_v45, %v373_v26 }
 0x115   :  { %v305_v29 = vmul.f32 %v304_v23, %v1509_v57  ;;  %v365_v46 = vrot.slane %v1465_v37, 4  ;;  %v379_v28 = vsel %vm370_vm4, %v1353_v1, %v354_v55 }
 0x116   :  { %1199 = vmatprep.subr.bf16.mxu0 %v1198_v27  ;;  %1207 = vmatprep.subr.bf16.mxu1 %v1206_v8 }
 0x117   :  { %v294_v50 = vpop.permute.xlu0 %293  ;;  %1209 = vmatpush1.bf16.msra.mxu1 %v1208_v47  ;;  %v296_v51 = vpop.permute.xlu1 %295  ;;  %1201 = vmatpush1.bf16.msra.mxu0 %v1200_v30  ;;  %v383_v54 = vsel %vm370_vm4, %v305_v29, %v362_v22  ;;  %v65_v47 = vld [vmem:[%s1847_s2] sm:$0xf] }
 0x118   :  { %v297_v58 = vsel %vm165_vm2, %v292_v35, %v294_v50  ;;  %v298_v59 = vsel %vm165_vm2, %v294_v50, %v296_v51  ;;  %v299_v60 = vsel %vm165_vm2, %v296_v51, %v286_v13  ;;  %v1204_v12 = vpack.c.bf16 %v383_v54, %v379_v28 }
 0x119   :  { %v306_v36 = vmul.f32 %v297_v58, %v1519_v63  ;;  %v307_v37 = vmul.f32 %v298_v59, %v1525_v7  ;;  %v308_v42 = vmul.f32 %v299_v60, %v1516_v62 }
 0x11b   :  { %v310_v56 = vpop.permute.xlu0 %309  ;;  %v312_v4 = vpop.permute.xlu1 %311  ;;  %v384_v5 = vsel %vm370_vm4, %v306_v36, %v363_v33  ;;  %v386_v43 = vsel %vm370_vm4, %v308_v42, %v365_v46  ;;  %v385_v11 = vsel %vm370_vm4, %v307_v37, %v364_v61 }
 0x11c   :  { %v1202_v16 = vpack.c.bf16 %v384_v5, %v380_v53  ;;  %v1210_v17 = vpack.c.bf16 %v386_v43, %v382_v52  ;;  %v1212_v25 = vpack.c.bf16 %v385_v11, %v381_v6  ;;  %v317_v34 = vsel %vm207_vm3, %v310_v56, %v312_v4 }
 0x11d   :  { %v326_v8 = vmul.f32 %v317_v34, %v1528_v10 }
 0x11e   :  { %1203 = vmatprep.subr.bf16.mxu0 %v1202_v16  ;;  %1211 = vmatprep.subr.bf16.mxu1 %v1210_v17 }
 0x11f   :  { %v314_v13 = vpop.permute.xlu0 %313  ;;  %1213 = vmatpush1.bf16.msra.mxu1 %v1212_v25  ;;  %v316_v35 = vpop.permute.xlu1 %315  ;;  %1205 = vmatpush1.bf16.msra.mxu0 %v1204_v12 }
 0x120   :  { %v318_v40 = vsel %vm207_vm3, %v312_v4, %v314_v13  ;;  %v319_v41 = vsel %vm207_vm3, %v314_v13, %v316_v35  ;;  %v325_v26 = vsel %vm207_vm3, %v316_v35, %v310_v56 }
 0x121   :  { %v327_v45 = vmul.f32 %v318_v40, %v1535_v19  ;;  %v328_v23 = vmul.f32 %v319_v41, %v1538_v24  ;;  %v329_v27 = vmul.f32 %v325_v26, %v1532_v18 }
 0x123   :  { %1179 = vmatprep.subr.msk.mxu0 %vm370_vm4, %v327_v45  ;;  %1182 = vmatprep.subr.msk.mxu1 %vm370_vm4, %v329_v27 }
 0x124   :  { %1180 = vmatpush1.msk.msra.mxu0 %vm370_vm4, %v326_v8  ;;  %1183 = vmatpush1.msk.msra.mxu1 %vm370_vm4, %v328_v23 }
 0x125   :  { %1181 = vmatmul.mubr.msk.f32.vlgmr.msra.gmra.mrb[0].mxu0 %vm387_vm5, %v65_v47  ;;  %1184 = vmatmul.mubr.msk.f32.vlgmr.msra.gmra.mrb[0].mxu1 %vm387_vm5, %v65_v47 }
 0x126   :  { %885 = vmatprep.mubr.f32.mxu0 %v1282_v44  ;;  %956 = vmatprep.mubr.f32.mxu1 %v1282_v44 }
 0x130   :  { %v549_v30 = vpop.permute.xlu0 %548  ;;  %v559_v48 = vpop.permute.xlu1 %558 }
 0x1f8   :  { %v469_v9 = vpop.f32.mrb[0].mxu0  ;;  %v540_v29 = vpop.f32.mrb[0].mxu1 }
 0x1f9   :  { %v551_v22 = vmul.f32 %v549_v30, %v469_v9  ;;  %v553_v46 = vmul.f32 %v549_v30, %v540_v29  ;;  %v471_v33 = vpop.f32.mrb[1].mxu0  ;;  %v542_v49 = vpop.f32.mrb[1].mxu1 }
 0x1fa   :  { %v554_v50 = vmul.f32 %v549_v30, %v542_v49  ;;  %v552_v55 = vmul.f32 %v549_v30, %v471_v33 }
 0x1fb   :  { %v561_v51 = vadd.f32 %v559_v48, %v551_v22  ;;  %v563_v58 = vadd.f32 %v559_v48, %v553_v46 }
 0x1fc   :  { %v564_v59 = vadd.f32 %v559_v48, %v554_v50  ;;  %v562_v61 = vadd.f32 %v559_v48, %v552_v55 }
 0x1fd   :  { %v1625_v60 = vmax.f32 %v561_v51, 0.0  ;;  %v1631_v36 = vmax.f32 %v563_v58, 0.0 }
 0x1fe   :  { %v1633_v37 = vmax.f32 %v564_v59, 0.0  ;;  %v1639_v42 = vmax.f32 %v562_v61, 0.0 }
 0x1ff   :  { %595 = vrot.lane.b32.xlu1 %v1625_v60, %s1279_s28  ;;  %577 = vrot.lane.b32.xlu0 %v1625_v60, %s1278_s27 }
 0x203   :  { %571 = vrot.lane.b32.xlu1 %v1633_v37, %s1278_s27  ;;  %581 = vrot.lane.b32.xlu0 %v1631_v36, %s1278_s27 }
 0x207   :  { %597 = vrot.lane.b32.xlu0 %v1639_v42, %s1279_s28  ;;  %579 = vrot.lane.b32.xlu1 %v1639_v42, %s1278_s27 }
 0x20b   :  { %601 = vrot.lane.b32.xlu0 %v1633_v37, %s1279_s28  ;;  %599 = vrot.lane.b32.xlu1 %v1631_v36, %s1279_s28 }
 0x20f   :  { %665 = vrot.lane.b32.xlu0 %v1625_v60, %s1280_s1  ;;  %683 = vrot.lane.b32.xlu1 %v1625_v60, %s1281_s29 }
 0x213   :  { %669 = vrot.lane.b32.xlu0 %v1631_v36, %s1280_s1  ;;  %687 = vrot.lane.b32.xlu1 %v1631_v36, %s1281_s29 }
 0x217   :  { %685 = vrot.lane.b32.xlu0 %v1639_v42, %s1281_s29  ;;  %662 = vrot.lane.b32.xlu1 %v1633_v37, %s1280_s1 }
 0x21b   :  { %689 = vrot.lane.b32.xlu0 %v1633_v37, %s1281_s29  ;;  %667 = vrot.lane.b32.xlu1 %v1639_v42, %s1280_s1 }
 0x271   :  { %v596_v53 = vpop.permute.xlu1 %595  ;;  %v578_v52 = vpop.permute.xlu0 %577 }
 0x275   :  { %v572_v54 = vpop.permute.xlu1 %571  ;;  %v582_v56 = vpop.permute.xlu0 %581 }
 0x276   :  { %v590_v4 = vsel %vm75_vm0, %v572_v54, %v578_v52  ;;  %v585_v5 = vsel %vm75_vm0, %v582_v56, %v572_v54 }
 0x277   :  { %v1668_v43 = vmul.f32 %v590_v4, %v1407_v14  ;;  %v1671_v6 = vmul.f32 %v585_v5, %v1410_v15 }
 0x279   :  { %623 = vrot.lane.b32.xlu0 %v1668_v43, %s1280_s1  ;;  %617 = vrot.lane.b32.xlu1 %v1671_v6, %s1280_s1  ;;  %v580_v11 = vpop.permute.xlu1 %579  ;;  %v598_v25 = vpop.permute.xlu0 %597  ;;  %v750_v50 = vrot.slane %v1668_v43, 4  ;;  %v753_v51 = vrot.slane %v1671_v6, 4 }
 0x27a   :  { %v583_v16 = vsel %vm75_vm0, %v578_v52, %v580_v11  ;;  %v584_v17 = vsel %vm75_vm0, %v580_v11, %v582_v56  ;;  %v603_v12 = vsel %vm117_vm1, %v596_v53, %v598_v25 }
 0x27b   :  { %v1680_v28 = vmul.f32 %v583_v16, %v1415_v20  ;;  %v1683_v14 = vmul.f32 %v584_v17, %v1418_v21  ;;  %v1700_v21 = vmul.f32 %v603_v12, %v1450_v31  ;;  %v973_v31 = vld [vmem:[%s1852_s7] sm:$0xf] }
 0x27d   :  { %627 = vrot.lane.b32.xlu0 %v1683_v14, %s1280_s1  ;;  %625 = vrot.lane.b32.xlu1 %v1680_v28, %s1280_s1  ;;  %v602_v15 = vpop.permute.xlu0 %601  ;;  %v600_v34 = vpop.permute.xlu1 %599  ;;  %v751_v55 = vrot.slane %v1680_v28, 4  ;;  %v752_v58 = vrot.slane %v1683_v14, 4 }
 0x27e   :  { %v611_v20 = vsel %vm117_vm1, %v602_v15, %v596_v53  ;;  %v604_v35 = vsel %vm117_vm1, %v598_v25, %v600_v34  ;;  %v605_v40 = vsel %vm117_vm1, %v600_v34, %v602_v15 }
 0x27f   :  { %v1703_v13 = vmul.f32 %v611_v20, %v1453_v32  ;;  %v1712_v41 = vmul.f32 %v604_v35, %v1468_v38  ;;  %v1715_v26 = vmul.f32 %v605_v40, %v1471_v39  ;;  %v963_v32 = vld [vmem:[%s1851_s6] sm:$0xf] }
 0x280   :  { %v992_v38 = vld [vmem:[%s1854_s9] sm:$0x7] }
 0x281   :  { %643 = vrot.lane.b32.xlu0 %v1680_v28, %s1281_s29  ;;  %641 = vrot.lane.b32.xlu1 %v1668_v43, %s1281_s29  ;;  %v666_v39 = vpop.permute.xlu0 %665  ;;  %v684_v45 = vpop.permute.xlu1 %683 }
 0x285   :  { %647 = vrot.lane.b32.xlu0 %v1671_v6, %s1281_s29  ;;  %645 = vrot.lane.b32.xlu1 %v1683_v14, %s1281_s29  ;;  %v670_v23 = vpop.permute.xlu0 %669  ;;  %v688_v27 = vpop.permute.xlu1 %687 }
 0x289   :  { %711 = vrot.lane.b32.xlu0 %v1700_v21, %s1280_s1  ;;  %705 = vrot.lane.b32.xlu1 %v1703_v13, %s1280_s1  ;;  %v686_v8 = vpop.permute.xlu0 %685  ;;  %v663_v47 = vpop.permute.xlu1 %662 }
 0x28a   :  { %v678_v22 = vsel %vm165_vm2, %v663_v47, %v666_v39  ;;  %v673_v46 = vsel %vm165_vm2, %v670_v23, %v663_v47  ;;  %v691_v53 = vsel %vm207_vm3, %v684_v45, %v686_v8  ;;  %v692_v52 = vsel %vm207_vm3, %v686_v8, %v688_v27 }
 0x28b   :  { %v679_v59 = vmul.f32 %v678_v22, %v1509_v57  ;;  %v682_v54 = vmul.f32 %v673_v46, %v1516_v62  ;;  %v1759_v15 = vmul.f32 %v691_v53, %v1528_v10  ;;  %v701_v12 = vmul.f32 %v692_v52, %v1535_v19 }
 0x28d   :  { %715 = vrot.lane.b32.xlu0 %v1715_v26, %s1280_s1  ;;  %713 = vrot.lane.b32.xlu1 %v1712_v41, %s1280_s1  ;;  %v690_v30 = vpop.permute.xlu0 %689  ;;  %v668_v48 = vpop.permute.xlu1 %667  ;;  %v762_v20 = vrot.slane %v679_v59, 4 }
 0x28e   :  { %v671_v61 = vsel %vm165_vm2, %v666_v39, %v668_v48  ;;  %v672_v56 = vsel %vm165_vm2, %v668_v48, %v670_v23  ;;  %v693_v4 = vsel %vm207_vm3, %v688_v27, %v690_v30  ;;  %v699_v17 = vsel %vm207_vm3, %v690_v30, %v684_v45 }
 0x28f   :  { %v680_v25 = vmul.f32 %v671_v61, %v1519_v63  ;;  %v681_v34 = vmul.f32 %v672_v56, %v1525_v7  ;;  %v702_v39 = vmul.f32 %v693_v4, %v1538_v24  ;;  %v703_v45 = vmul.f32 %v699_v17, %v1532_v18 }
 0x290   :  { %v775_v17 = vrot.slane %v701_v12, 4 }
 0x291   :  { %731 = vrot.lane.b32.xlu0 %v1712_v41, %s1281_s29  ;;  %729 = vrot.lane.b32.xlu1 %v1700_v21, %s1281_s29  ;;  %v763_v47 = vrot.slane %v680_v25, 4  ;;  %v776_v25 = vrot.slane %v702_v39, 4 }
 0x295   :  { %735 = vrot.lane.b32.xlu0 %v1703_v13, %s1281_s29  ;;  %733 = vrot.lane.b32.xlu1 %v1715_v26, %s1281_s29 }
 0x299   :  { %976 = vperm.xlu0 %1239, %v973_v31   ;;  %966 = vperm.xlu1 %1240, %v963_v32  }
 0x29d   :  { %995 = vperm.xlu1 %1240, %v992_v38   ;;  %v765_v38 = vrot.slane %v682_v54, 4 }
 0x2eb   :  { %v624_v9 = vpop.permute.xlu0 %623  ;;  %v618_v29 = vpop.permute.xlu1 %617 }
 0x2ec   :  { %v636_v5 = vsel %vm165_vm2, %v618_v29, %v624_v9 }
 0x2ed   :  { %v637_v35 = vmul.f32 %v636_v5, %v1509_v57 }
 0x2ef   :  { %v628_v33 = vpop.permute.xlu0 %627  ;;  %v626_v49 = vpop.permute.xlu1 %625 }
 0x2f0   :  { %v629_v43 = vsel %vm165_vm2, %v624_v9, %v626_v49  ;;  %v630_v6 = vsel %vm165_vm2, %v626_v49, %v628_v33  ;;  %v631_v28 = vsel %vm165_vm2, %v628_v33, %v618_v29  ;;  %v764_v29 = vrot.slane %v681_v34, 4 }
 0x2f1   :  { %v638_v40 = vmul.f32 %v629_v43, %v1519_v63  ;;  %v639_v31 = vmul.f32 %v630_v6, %v1525_v7  ;;  %v640_v23 = vmul.f32 %v631_v28, %v1516_v62  ;;  %v790_v49 = vsel %vm370_vm4, %v637_v35, %v750_v50 }
 0x2f2   :  { %v782_v28 = vrot.slane %v1700_v21, 4 }
 0x2f3   :  { %v644_v11 = vpop.permute.xlu0 %643  ;;  %v642_v16 = vpop.permute.xlu1 %641  ;;  %v792_v59 = vsel %vm370_vm4, %v639_v31, %v752_v58  ;;  %v791_v53 = vsel %vm370_vm4, %v638_v40, %v751_v55  ;;  %v793_v5 = vsel %vm370_vm4, %v640_v23, %v753_v51  ;;  %v783_v51 = vrot.slane %v1712_v41, 4 }
 0x2f4   :  { %v649_v14 = vsel %vm207_vm3, %v642_v16, %v644_v11  ;;  %v774_v40 = vrot.slane %v1759_v15, 4  ;;  %v799_v15 = vsel %vm370_vm4, %v1639_v42, %v775_v17 }
 0x2f5   :  { %v658_v32 = vmul.f32 %v649_v14, %v1528_v10  ;;  %v785_v14 = vrot.slane %v1703_v13, 4 }
 0x2f7   :  { %v648_v27 = vpop.permute.xlu0 %647  ;;  %v646_v8 = vpop.permute.xlu1 %645  ;;  %v794_v61 = vsel %vm370_vm4, %v658_v32, %v762_v20  ;;  %v777_v20 = vrot.slane %v703_v45, 4  ;;  %v784_v32 = vrot.slane %v1715_v26, 4 }
 0x2f8   :  { %v657_v30 = vsel %vm207_vm3, %v648_v27, %v642_v16  ;;  %v650_v48 = vsel %vm207_vm3, %v644_v11, %v646_v8  ;;  %v651_v9 = vsel %vm207_vm3, %v646_v8, %v648_v27  ;;  %v1216_v58 = vpack.c.bf16 %v794_v61, %v790_v49 }
 0x2f9   :  { %v661_v22 = vmul.f32 %v657_v30, %v1532_v18  ;;  %v659_v46 = vmul.f32 %v650_v48, %v1535_v19  ;;  %v660_v33 = vmul.f32 %v651_v9, %v1538_v24 }
 0x2fb   :  { %v796_v52 = vsel %vm370_vm4, %v660_v33, %v764_v29  ;;  %v712_v54 = vpop.permute.xlu0 %711  ;;  %v706_v56 = vpop.permute.xlu1 %705  ;;  %v795_v4 = vsel %vm370_vm4, %v659_v46, %v763_v47  ;;  %v797_v43 = vsel %vm370_vm4, %v661_v22, %v765_v38  ;;  %v800_v38 = vsel %vm370_vm4, %v1631_v36, %v776_v25 }
 0x2fc   :  { %v724_v6 = vsel %vm165_vm2, %v706_v56, %v712_v54  ;;  %v1214_v11 = vpack.c.bf16 %v795_v4, %v791_v53  ;;  %v1222_v50 = vpack.c.bf16 %v797_v43, %v793_v5  ;;  %v1224_v16 = vpack.c.bf16 %v796_v52, %v792_v59  ;;  %v569_v59 = vld [vmem:[%s1850_s5] sm:$0xf] }
 0x2fd   :  { %v725_v55 = vmul.f32 %v724_v6, %v1509_v57 }
 0x2fe   :  { %1215 = vmatprep.subr.bf16.mxu0 %v1214_v11  ;;  %1223 = vmatprep.subr.bf16.mxu1 %v1222_v50 }
 0x2ff   :  { %v716_v34 = vpop.permute.xlu0 %715  ;;  %1217 = vmatpush1.bf16.msra.mxu0 %v1216_v58  ;;  %1225 = vmatpush1.bf16.msra.mxu1 %v1224_v16  ;;  %v714_v35 = vpop.permute.xlu1 %713  ;;  %v802_v39 = vsel %vm370_vm4, %v725_v55, %v782_v28 }
 0x300   :  { %v719_v12 = vsel %vm165_vm2, %v716_v34, %v706_v56  ;;  %v717_v31 = vsel %vm165_vm2, %v712_v54, %v714_v35  ;;  %v718_v57 = vsel %vm165_vm2, %v714_v35, %v716_v34 }
 0x301   :  { %v728_v21 = vmul.f32 %v719_v12, %v1516_v62  ;;  %v726_v13 = vmul.f32 %v717_v31, %v1519_v63  ;;  %v727_v41 = vmul.f32 %v718_v57, %v1525_v7  ;;  %v801_v62 = vsel %vm370_vm4, %v1633_v37, %v777_v20 }
 0x302   :  { %v798_v7 = vsel %vm370_vm4, %v1625_v60, %v774_v40 }
 0x303   :  { %v804_v45 = vsel %vm370_vm4, %v727_v41, %v784_v32  ;;  %v732_v23 = vpop.permute.xlu0 %731  ;;  %v730_v27 = vpop.permute.xlu1 %729  ;;  %v803_v26 = vsel %vm370_vm4, %v726_v13, %v783_v51  ;;  %v805_v63 = vsel %vm370_vm4, %v728_v21, %v785_v14  ;;  %v1220_v30 = vpack.c.bf16 %v802_v39, %v798_v7  ;;  %v991_v14 = vld [vmem:[%s1853_s8] sm:$0x7] }
 0x304   :  { %v1218_v36 = vpack.c.bf16 %v803_v26, %v799_v15  ;;  %v1226_v8 = vpack.c.bf16 %v805_v63, %v801_v62  ;;  %v1228_v47 = vpack.c.bf16 %v804_v45, %v800_v38  ;;  %v737_v42 = vsel %vm207_vm3, %v730_v27, %v732_v23 }
 0x305   :  { %v746_v49 = vmul.f32 %v737_v42, %v1528_v10 }
 0x306   :  { %1219 = vmatprep.subr.bf16.mxu0 %v1218_v36  ;;  %1227 = vmatprep.subr.bf16.mxu1 %v1226_v8 }
 0x307   :  { %v736_v48 = vpop.permute.xlu0 %735  ;;  %1221 = vmatpush1.bf16.msra.mxu0 %v1220_v30  ;;  %1229 = vmatpush1.bf16.msra.mxu1 %v1228_v47  ;;  %v734_v9 = vpop.permute.xlu1 %733 }
 0x308   :  { %v745_v29 = vsel %vm207_vm3, %v736_v48, %v730_v27  ;;  %v738_v37 = vsel %vm207_vm3, %v732_v23, %v734_v9  ;;  %v739_v22 = vsel %vm207_vm3, %v734_v9, %v736_v48 }
 0x309   :  { %v749_v60 = vmul.f32 %v745_v29, %v1532_v18  ;;  %v747_v46 = vmul.f32 %v738_v37, %v1535_v19  ;;  %v748_v33 = vmul.f32 %v739_v22, %v1538_v24 }
 0x30b   :  { %1185 = vmatprep.subr.msk.mxu0 %vm370_vm4, %v747_v46  ;;  %1188 = vmatprep.subr.msk.mxu1 %vm370_vm4, %v749_v60 }
 0x30c   :  { %1186 = vmatpush1.msk.msra.mxu0 %vm370_vm4, %v746_v49  ;;  %1189 = vmatpush1.msk.msra.mxu1 %vm370_vm4, %v748_v33 }
 0x30d   :  { %1187 = vmatmul.mubr.msk.f32.vlgmr.msra.gmra.mrb[2].mxu0 %vm387_vm5, %v569_v59  ;;  %1190 = vmatmul.mubr.msk.f32.vlgmr.msra.gmra.mrb[2].mxu1 %vm387_vm5, %v569_v59 }
 0x30e   :  { %1078 = vmatprep.mubr.f32.mxu0 %v1282_v44  ;;  %1149 = vmatprep.mubr.f32.mxu1 %v1282_v44 }
 0x318   :  { %v967_v10 = vpop.permute.xlu1 %966  ;;  %v977_v54 = vpop.permute.xlu0 %976 }
 0x3e0   :  { %v887_v18 = vpop.f32.mrb[2].mxu0  ;;  %v958_v19 = vpop.f32.mrb[2].mxu1 }
 0x3e1   :  { %v969_v24 = vmul.f32 %v967_v10, %v887_v18  ;;  %v971_v61 = vmul.f32 %v967_v10, %v958_v19  ;;  %v889_v53 = vpop.f32.mrb[3].mxu0  ;;  %v960_v52 = vpop.f32.mrb[3].mxu1 }
 0x3e2   :  { %v970_v56 = vmul.f32 %v967_v10, %v889_v53  ;;  %v972_v4 = vmul.f32 %v967_v10, %v960_v52 }
 0x3e3   :  { %v979_v5 = vadd.f32 %v977_v54, %v969_v24  ;;  %v981_v43 = vadd.f32 %v977_v54, %v971_v61 }
 0x3e4   :  { %v980_v6 = vadd.f32 %v977_v54, %v970_v56  ;;  %v982_v11 = vadd.f32 %v977_v54, %v972_v4 }
 0x3e5   :  { %v983_v50 = vadd.f32 %v979_v5, %v1353_v1  ;;  %v985_v16 = vadd.f32 %v981_v43, %v1351_v0  ;;  %v996_v0 = vpop.permute.xlu1 %995 }
 0x3e6   :  { %v984_v44 = vadd.f32 %v980_v6, %v1361_v2  ;;  %v986_v58 = vadd.f32 %v982_v11, %v1369_v3 }
 0x3e7   :  { %v987_v55 = vmax.f32 %v983_v50, 0.0  ;;  %v989_v28 = vmax.f32 %v985_v16, 0.0 }
 0x3e8   :  { %v988_v17 = vmax.f32 %v984_v44, 0.0  ;;  %v990_v25 = vmax.f32 %v986_v58, 0.0 }
 0x3ea   :  { %1191 = vmatprep.subr.msk.mxu0 %vm370_vm4, %v988_v17  ;;  %1194 = vmatprep.subr.msk.mxu1 %vm370_vm4, %v990_v25 }
 0x3eb   :  { %1192 = vmatpush1.msk.msra.mxu0 %vm370_vm4, %v987_v55  ;;  %1195 = vmatpush1.msk.msra.mxu1 %vm370_vm4, %v989_v28 }
 0x3ec   :  { %1193 = vmatmul.mubr.msk.f32.vlgmr.msra.gmra.mrb[4].mxu0 %vm998_vm6, %v991_v14  ;;  %1196 = vmatmul.mubr.msk.f32.vlgmr.msra.gmra.mrb[4].mxu1 %vm998_vm6, %v991_v14 }
 0x4bf   :  { %v1080_v1 = vpop.f32.mrb[4].mxu0  ;;  %v1151_v2 = vpop.f32.mrb[4].mxu1 }
 0x4c0   :  { %v1081_v3 = vadd.f32 %v1080_v1, %v996_v0  ;;  %v1152_v51 = vadd.f32 %v1151_v2, %v996_v0  ;;  %v1082_v20 = vpop.f32.mrb[5].mxu0  ;;  %v1153_v34 = vpop.f32.mrb[5].mxu1 }
 0x4c1   :  { %v1083_v35 = vadd.f32 %v1082_v20, %v996_v0  ;;  %v1154_v40 = vadd.f32 %v1153_v34, %v996_v0 }
 0x4c2   :  { %1243 = vtanh.f32 %v1081_v3 }
 0x4c3   :  { %1245 = vtanh.f32 %v1152_v51 }
 0x4c4   :  { %1247 = vtanh.f32 %v1083_v35 }
 0x4c5   :  { %1249 = vtanh.f32 %v1154_v40 }
 0x4cc   :  { %v1244_v12 = vpop.eup %1243 }
 0x4cd   :  { %v1246_v31 = vpop.eup %1245 }
 0x4ce   :  { %v1248_v57 = vpop.eup %1247 }
 0x4cf   :  { %v1250_v32 = vpop.eup %1249  ;;  %v1162_v21 = vcombine.low %v1244_v12, %v1248_v57 }
 0x4d0   :  { %v1167_v13 = vcombine.low %v1246_v31, %v1250_v32 }
 0x4d1   :  { %1164 = vst [vmem:[%s1855_s10] sm:$0x77] %v1162_v21 }
 0x4d2   :  { %1197 = vst [vmem:[%s1855_s10 + $0x8] sm:$0x77] %v1167_v13 }
 0x4d3   :  { %1175 = vsyncpa [#allocation3], 1 }

</bundles_post_ra>
